<compile_context>
chip_gen: v7x
topology: tpu7x:2x2x1
jax: 0.10.0
libtpu: 0.0.40
codegen_flags: <defaults>
</compile_context>

<pallas_src>
import functools

import jax
import jax.numpy as jnp
from jax import lax
from jax.experimental import pallas as pl
from jax.experimental.pallas import tpu as pltpu

EPS = 1e-12


def _round_up(x, m):
    return ((x + m - 1) // m) * m


def _sublane(dtype):
    # Minimum sublane multiple for packed dtypes: f32 -> 8, bf16 -> 16, int8 -> 32.
    return max(8, 32 // jnp.dtype(dtype).itemsize)


def bert_output_kernel(h_ref, inp_ref, w_ref, b_ref, g_ref, beta_ref, o_ref, acc_ref):
    # h_ref:    (TM, TK) tile of hidden_states (intermediate activations)
    # inp_ref:  (TM, H)  tile of the residual input_tensor
    # w_ref:    (TK, H)  pre-transposed dense weight (MXU-native: contract dim 0)
    # b_ref:    (1, H)   dense bias (f32)
    # g_ref:    (1, H)   LayerNorm gamma (f32)
    # beta_ref: (1, H)   LayerNorm beta  (f32)
    # acc_ref:  (TM, H)  f32 accumulator scratch, persists across the K axis
    k = pl.program_id(1)

    @pl.when(k == 0)
    def _():
        acc_ref[...] = jnp.zeros_like(acc_ref)

    # Dense partial product: operands stay in native dtype (bf16 on the MXU),
    # f32 accumulation. RHS contracts on its first (sublane) dim -> no
    # in-kernel vxpose of the weight.
    acc_ref[...] += jnp.dot(h_ref[...], w_ref[...],
                            preferred_element_type=jnp.float32)

    @pl.when(k == pl.num_programs(1) - 1)
    def _():
        # TODO(synk): dropout is identity here (inference mode); training
        # dropout would use pltpu.prng_seed + pltpu.prng_random_bits.
        x = acc_ref[...] + b_ref[...] + inp_ref[...].astype(jnp.float32)
        # LayerNorm over the hidden (lane) axis, eps=1e-12.
        u = jnp.mean(x, axis=-1, keepdims=True)
        xc = x - u
        s = jnp.mean(xc * xc, axis=-1, keepdims=True)
        out = xc * lax.rsqrt(s + EPS) * g_ref[...] + beta_ref[...]
        o_ref[...] = out.astype(o_ref.dtype)


@functools.partial(jax.jit,
                   static_argnames=("block_rows", "block_k", "compute_dtype"))
def bert_output(hidden_states, input_tensor, w, b, gamma, beta,
                *, block_rows=512, block_k=None, compute_dtype=jnp.bfloat16):
    """hidden_states: [N, I]; input_tensor: [N, H]; w: [H, I] (PyTorch Linear layout)."""
    n, inter = hidden_states.shape
    n2, h = input_tensor.shape
    assert n2 == n and w.shape == (h, inter) and b.shape == (h,)

    # Keep MXU operands bf16 (no TPU generation has a native f32 MXU);
    # residual and epilogue stay f32.
    if compute_dtype is not None and hidden_states.dtype != compute_dtype:
        hs = hidden_states.astype(compute_dtype)
        wt = w.astype(compute_dtype)
    else:
        hs = hidden_states
        wt = w
    # One-time wrapper transpose to [I, H] (amortized over the whole grid).
    wt = wt.T

    # K (intermediate) tiling: off by default (weight fully resident,
    # single-buffered); enable for large configs / small-VMEM chips (v7x).
    if block_k is None or block_k >= inter:
        tk = inter
    else:
        if inter % block_k != 0:
            raise ValueError("block_k must divide the intermediate size")
        if block_k % 128 != 0:
            raise ValueError("block_k must be a multiple of 128 (lane constraint)")
        tk = block_k
    num_k = inter // tk

    # Row (token) tiling; sublane multiple accounts for mixed dtypes.
    sub = max(_sublane(hs.dtype), _sublane(input_tensor.dtype))
    tm = max(sub, min(block_rows, _round_up(n, sub)))
    tm = _round_up(tm, sub)
    # v7x megacore: prefer >= 2 row-grid iterations so both TensorCores work.
    if pl.cdiv(n, tm) < 2 and n >= 2 * sub:
        tm = _round_up(pl.cdiv(n, 2), sub)
    num_m = pl.cdiv(n, tm)  # ragged tail handled by a partial last block

    # Pre-cast tiny per-feature params to f32 rows once (no per-iter casts).
    b2 = b.reshape(1, h).astype(jnp.float32)
    g2 = gamma.reshape(1, h).astype(jnp.float32)
    beta2 = beta.reshape(1, h).astype(jnp.float32)

    # Grid-invariant weight (num_k == 1): single-buffer it.
    if num_k == 1:
        w_spec = pl.BlockSpec((tk, h), lambda i, k: (k, 0),
                              pipeline_mode=pl.Buffered(1))
    else:
        w_spec = pl.BlockSpec((tk, h), lambda i, k: (k, 0))

    # Explicit VMEM budget sized to the real footprint, clamped for v7x.
    act_b = jnp.dtype(hs.dtype).itemsize
    res_b = jnp.dtype(input_tensor.dtype).itemsize
    out_b = jnp.dtype(input_tensor.dtype).itemsize
    footprint = ((1 if num_k == 1 else 2) * tk * h * act_b   # weight buffer(s)
                 + 2 * tm * tk * act_b                       # streamed hidden tile
                 + 2 * tm * h * res_b                        # residual tile
                 + 2 * tm * h * out_b                        # output tile
                 + tm * h * 4                                # acc scratch
                 + 4 * tm * h * 4                            # f32 epilogue temporaries
                 + 6 * h * 4)                                # bias/gamma/beta rows
    vmem_limit = min(max(int(footprint * 1.25) + (2 << 20), 32 << 20), 64 << 20)

    out = pl.pallas_call(
        bert_output_kernel,
        out_shape=jax.ShapeDtypeStruct((n, h), input_tensor.dtype),
        grid_spec=pltpu.PrefetchScalarGridSpec(
            num_scalar_prefetch=0,
            grid=(num_m, num_k),
            in_specs=[
                pl.BlockSpec((tm, tk), lambda i, k: (i, k)),   # hidden tile [TM, TK]
                pl.BlockSpec((tm, h), lambda i, k: (i, 0)),    # residual tile [TM, H]
                w_spec,                                        # weight [TK, H]
                pl.BlockSpec((1, h), lambda i, k: (0, 0)),     # bias
                pl.BlockSpec((1, h), lambda i, k: (0, 0)),     # gamma
                pl.BlockSpec((1, h), lambda i, k: (0, 0)),     # beta
            ],
            out_specs=pl.BlockSpec((tm, h), lambda i, k: (i, 0)),
            scratch_shapes=[pltpu.VMEM((tm, h), jnp.float32)],
        ),
        compiler_params=pltpu.CompilerParams(
            dimension_semantics=("parallel", "arbitrary"),
            vmem_limit_bytes=vmem_limit),
    )(hs, input_tensor, wt, b2, g2, beta2)

    return out


def reference(hidden_states, input_tensor, w, b, gamma, beta, matmul_dtype=None):
    hs = hidden_states if matmul_dtype is None else hidden_states.astype(matmul_dtype)
    wt = w if matmul_dtype is None else w.astype(matmul_dtype)
    y = jnp.dot(hs, wt.T, preferred_element_type=jnp.float32,
                precision=lax.Precision.HIGHEST).astype(jnp.float32)
    x = y + b.astype(jnp.float32) + input_tensor.astype(jnp.float32)
    u = jnp.mean(x, axis=-1, keepdims=True)
    s = jnp.mean((x - u) ** 2, axis=-1, keepdims=True)
    return gamma * (x - u) / jnp.sqrt(s + EPS) + beta


if __name__ == "__main__":
    # Small shapes consistent with BertOutput: batch=2, seq=8,
    # intermediate=64 -> hidden=32, N = 16 tokens.
    batch, seq, hidden, intermediate = 2, 8, 32, 64
    n = batch * seq

    key = jax.random.PRNGKey(0)
    k1, k2, k3, k4, k5, k6, k7, k8, k9, k10 = jax.random.split(key, 10)

    hidden_states = jax.random.normal(k1, (n, intermediate), dtype=jnp.float32)
    input_tensor = jax.random.normal(k2, (n, hidden), dtype=jnp.float32)
    w = jax.random.normal(k3, (hidden, intermediate), dtype=jnp.float32) * 0.02
    b = jax.random.normal(k4, (hidden,), dtype=jnp.float32) * 0.02
    gamma = 1.0 + 0.1 * jax.random.normal(k5, (hidden,), dtype=jnp.float32)
    beta = 0.1 * jax.random.normal(k6, (hidden,), dtype=jnp.float32)

    # 1) f32 operand path (no dtype cast), weight resident + single-buffered.
    out_f32 = jax.block_until_ready(
        bert_output(hidden_states, input_tensor, w, b, gamma, beta,
                    compute_dtype=None))
    ref_f32 = reference(hidden_states, input_tensor, w, b, gamma, beta)
    assert out_f32.shape == (n, hidden)
    assert jnp.allclose(out_f32, ref_f32, atol=5e-3, rtol=5e-3), "f32 path mismatch"

    # 2) Default bf16-MXU path (f32 accumulation / f32 epilogue in the kernel).
    out_bf16 = jax.block_until_ready(
        bert_output(hidden_states, input_tensor, w, b, gamma, beta))
    ref_bf16 = reference(hidden_states, input_tensor, w, b, gamma, beta,
                         matmul_dtype=jnp.bfloat16)
    assert jnp.allclose(out_bf16, ref_bf16, atol=1e-2, rtol=1e-2), "bf16 path mismatch"

    # 3) K-tiled path (pattern used for large configs / v7x's smaller VMEM).
    hidden2, inter2 = 64, 256
    hs2 = jax.random.normal(k7, (n, inter2), dtype=jnp.float32)
    it2 = jax.random.normal(k8, (n, hidden2), dtype=jnp.float32)
    w2 = jax.random.normal(k9, (hidden2, inter2), dtype=jnp.float32) * 0.02
    b_2 = jax.random.normal(k10, (hidden2,), dtype=jnp.float32) * 0.02
    g_2 = jnp.ones((hidden2,), jnp.float32)
    be_2 = jnp.zeros((hidden2,), jnp.float32)
    out_kt = jax.block_until_ready(
        bert_output(hs2, it2, w2, b_2, g_2, be_2, block_k=128))
    ref_kt = reference(hs2, it2, w2, b_2, g_2, be_2, matmul_dtype=jnp.bfloat16)
    assert out_kt.shape == (n, hidden2)
    assert jnp.allclose(out_kt, ref_kt, atol=1e-2, rtol=1e-2), "K-tiled path mismatch"

    print("KERNEL_OK")
</pallas_src>

<mosaic_0001>
module attributes {stable_mosaic.version = 11 : i64} {
  func.func @bert_output_kernel(%arg0: i32, %arg1: i32, %arg2: memref<8x64xf32, #tpu.memory_space<vmem>>, %arg3: memref<8x32xf32, #tpu.memory_space<vmem>>, %arg4: memref<64x32xf32, #tpu.memory_space<vmem>>, %arg5: memref<1x32xf32, #tpu.memory_space<vmem>>, %arg6: memref<1x32xf32, #tpu.memory_space<vmem>>, %arg7: memref<1x32xf32, #tpu.memory_space<vmem>>, %arg8: memref<8x32xf32, #tpu.memory_space<vmem>>, %arg9: memref<8x32xf32, #tpu.memory_space<vmem>>) attributes {dimension_semantics = [#tpu.dimension_semantics<parallel>, #tpu.dimension_semantics<arbitrary>], iteration_bounds = array<i64: 2, 1>, scalar_prefetch = 0 : i64, scratch_operands = 1 : i64, tpu.core_type = #tpu.core_type<tc>, window_params = [{transform_indices = @transform_0, window_bounds = array<i64: 8, 64>}, {transform_indices = @transform_1, window_bounds = array<i64: 8, 32>}, {pipeline_mode = #tpu.pipeline_mode<synchronous>, transform_indices = @transform_2, window_bounds = array<i64: 64, 32>}, {pipeline_mode = #tpu.pipeline_mode<synchronous>, transform_indices = @transform_3, window_bounds = array<i64: 1, 32>}, {pipeline_mode = #tpu.pipeline_mode<synchronous>, transform_indices = @transform_4, window_bounds = array<i64: 1, 32>}, {pipeline_mode = #tpu.pipeline_mode<synchronous>, transform_indices = @transform_5, window_bounds = array<i64: 1, 32>}, {transform_indices = @transform_6, window_bounds = array<i64: 8, 32>}]} {
    %c0_i32 = arith.constant 0 : i32
    %0 = arith.cmpi eq, %arg1, %c0_i32 : i32
    %1 = arith.extui %0 : i1 to i32
    %c0_i32_0 = arith.constant 0 : i32
    %2 = arith.cmpi ne, %1, %c0_i32_0 : i32
    scf.if %2 {
      %cst_10 = arith.constant 0.000000e+00 : f32
      %12 = vector.broadcast %cst_10 : f32 to vector<8x32xf32>
      %c0_11 = arith.constant 0 : index
      %c0_12 = arith.constant 0 : index
      %13 = vector.load %arg9[%c0_11, %c0_12] : memref<8x32xf32, #tpu.memory_space<vmem>>, vector<8x32xf32>
      tpu.vector_store %arg9[%c0_11, %c0_12], %12 {strides = array<i32>} : memref<8x32xf32, #tpu.memory_space<vmem>>, vector<8x32xf32>,
    } else {
    }
    %c0 = arith.constant 0 : index
    %c0_1 = arith.constant 0 : index
    %3 = vector.load %arg9[%c0, %c0_1] : memref<8x32xf32, #tpu.memory_space<vmem>>, vector<8x32xf32>
    %c0_2 = arith.constant 0 : index
    %c0_3 = arith.constant 0 : index
    %4 = vector.load %arg2[%c0_2, %c0_3] : memref<8x64xf32, #tpu.memory_space<vmem>>, vector<8x64xf32>
    %c0_4 = arith.constant 0 : index
    %c0_5 = arith.constant 0 : index
    %5 = vector.load %arg4[%c0_4, %c0_5] : memref<64x32xf32, #tpu.memory_space<vmem>>, vector<64x32xf32>
    %cst = arith.constant dense<0.000000e+00> : vector<8x32xf32>
    %6 = tpu.matmul %4, %5, %cst {dimension_numbers = #tpu.dot_dimension_numbers<[1], [0], [0], [1], [0, 0, 1, 1], [], []>} : vector<8x64xf32>, vector<64x32xf32>, vector<8x32xf32> -> vector<8x32xf32>
    %7 = arith.addf %3, %6 : vector<8x32xf32>
    %c0_6 = arith.constant 0 : index
    %c0_7 = arith.constant 0 : index
    %8 = vector.load %arg9[%c0_6, %c0_7] : memref<8x32xf32, #tpu.memory_space<vmem>>, vector<8x32xf32>
    tpu.vector_store %arg9[%c0_6, %c0_7], %7 {strides = array<i32>} : memref<8x32xf32, #tpu.memory_space<vmem>>, vector<8x32xf32>,
    %c0_i32_8 = arith.constant 0 : i32
    %9 = arith.cmpi eq, %arg1, %c0_i32_8 : i32
    %10 = arith.extui %9 : i1 to i32
    %c0_i32_9 = arith.constant 0 : i32
    %11 = arith.cmpi ne, %10, %c0_i32_9 : i32
    scf.if %11 {
      %c0_10 = arith.constant 0 : index
      %c0_11 = arith.constant 0 : index
      %12 = vector.load %arg9[%c0_10, %c0_11] : memref<8x32xf32, #tpu.memory_space<vmem>>, vector<8x32xf32>
      %c0_12 = arith.constant 0 : index
      %c0_13 = arith.constant 0 : index
      %13 = vector.load %arg5[%c0_12, %c0_13] : memref<1x32xf32, #tpu.memory_space<vmem>>, vector<1x32xf32>
      %14 = vector.broadcast %13 : vector<1x32xf32> to vector<8x32xf32>
      %15 = arith.addf %12, %14 : vector<8x32xf32>
      %c0_14 = arith.constant 0 : index
      %c0_15 = arith.constant 0 : index
      %16 = vector.load %arg3[%c0_14, %c0_15] : memref<8x32xf32, #tpu.memory_space<vmem>>, vector<8x32xf32>
      %17 = arith.addf %15, %16 : vector<8x32xf32>
      %cst_16 = arith.constant dense<0.000000e+00> : vector<8xf32>
      %18 = vector.multi_reduction <add>, %17, %cst_16 [1] : vector<8x32xf32> to vector<8xf32>
      %19 = vector.shape_cast %18 : vector<8xf32> to vector<8x1xf32>
      %cst_17 = arith.constant 3.200000e+01 : f32
      %20 = vector.broadcast %cst_17 : f32 to vector<8x1xf32>
      %21 = arith.divf %19, %20 : vector<8x1xf32>
      %22 = vector.broadcast %21 : vector<8x1xf32> to vector<8x32xf32>
      %23 = arith.subf %17, %22 : vector<8x32xf32>
      %24 = arith.mulf %23, %23 : vector<8x32xf32>
      %cst_18 = arith.constant dense<0.000000e+00> : vector<8xf32>
      %25 = vector.multi_reduction <add>, %24, %cst_18 [1] : vector<8x32xf32> to vector<8xf32>
      %26 = vector.shape_cast %25 : vector<8xf32> to vector<8x1xf32>
      %cst_19 = arith.constant 3.200000e+01 : f32
      %27 = vector.broadcast %cst_19 : f32 to vector<8x1xf32>
      %28 = arith.divf %26, %27 : vector<8x1xf32>
      %cst_20 = arith.constant 9.99999996E-13 : f32
      %29 = vector.broadcast %cst_20 : f32 to vector<8x1xf32>
      %30 = arith.addf %28, %29 : vector<8x1xf32>
      %31 = math.rsqrt %30 : vector<8x1xf32>
      %32 = vector.broadcast %31 : vector<8x1xf32> to vector<8x32xf32>
      %33 = arith.mulf %23, %32 : vector<8x32xf32>
      %c0_21 = arith.constant 0 : index
      %c0_22 = arith.constant 0 : index
      %34 = vector.load %arg6[%c0_21, %c0_22] : memref<1x32xf32, #tpu.memory_space<vmem>>, vector<1x32xf32>
      %35 = vector.broadcast %34 : vector<1x32xf32> to vector<8x32xf32>
      %36 = arith.mulf %33, %35 : vector<8x32xf32>
      %c0_23 = arith.constant 0 : index
      %c0_24 = arith.constant 0 : index
      %37 = vector.load %arg7[%c0_23, %c0_24] : memref<1x32xf32, #tpu.memory_space<vmem>>, vector<1x32xf32>
      %38 = vector.broadcast %37 : vector<1x32xf32> to vector<8x32xf32>
      %39 = arith.addf %36, %38 : vector<8x32xf32>
      %c0_25 = arith.constant 0 : index
      %c0_26 = arith.constant 0 : index
      %40 = vector.load %arg8[%c0_25, %c0_26] : memref<8x32xf32, #tpu.memory_space<vmem>>, vector<8x32xf32>
      tpu.vector_store %arg8[%c0_25, %c0_26], %39 {strides = array<i32>} : memref<8x32xf32, #tpu.memory_space<vmem>>, vector<8x32xf32>,
    } else {
    }
    return
  }
  func.func @transform_0(%arg0: i32, %arg1: i32) -> (i32, i32) {
    %c0_i32 = arith.constant 0 : i32
    return %arg0, %arg1 : i32, i32
  }
  func.func @transform_1(%arg0: i32, %arg1: i32) -> (i32, i32) {
    %c0_i32 = arith.constant 0 : i32
    %c0_i32_0 = arith.constant 0 : i32
    return %arg0, %c0_i32 : i32, i32
  }
  func.func @transform_2(%arg0: i32, %arg1: i32) -> (i32, i32) {
    %c0_i32 = arith.constant 0 : i32
    %c0_i32_0 = arith.constant 0 : i32
    return %arg1, %c0_i32 : i32, i32
  }
  func.func @transform_3(%arg0: i32, %arg1: i32) -> (i32, i32) {
    %c0_i32 = arith.constant 0 : i32
    %c0_i32_0 = arith.constant 0 : i32
    %c0_i32_1 = arith.constant 0 : i32
    return %c0_i32, %c0_i32_0 : i32, i32
  }
  func.func @transform_4(%arg0: i32, %arg1: i32) -> (i32, i32) {
    %c0_i32 = arith.constant 0 : i32
    %c0_i32_0 = arith.constant 0 : i32
    %c0_i32_1 = arith.constant 0 : i32
    return %c0_i32, %c0_i32_0 : i32, i32
  }
  func.func @transform_5(%arg0: i32, %arg1: i32) -> (i32, i32) {
    %c0_i32 = arith.constant 0 : i32
    %c0_i32_0 = arith.constant 0 : i32
    %c0_i32_1 = arith.constant 0 : i32
    return %c0_i32, %c0_i32_0 : i32, i32
  }
  func.func @transform_6(%arg0: i32, %arg1: i32) -> (i32, i32) {
    %c0_i32 = arith.constant 0 : i32
    %c0_i32_0 = arith.constant 0 : i32
    return %arg0, %c0_i32 : i32, i32
  }
}

</mosaic_0001>

<bundles_post_ra>
// kernel: bert_output.1
= control target key start
LH: loop header
LB: loop body
LE: loop exit
PB: predicated region body
PF: predicated region fallthrough
CT: control target
= control target key end

     0   :  { %11 = vsyncpa [#allocation4], 0  ;;  %s947_s0 = inlined_call_operand.vmem [shape: f32[16,64], index: 0, kind: input, shape index: {}]   ;;  %s948_s1 = inlined_call_operand.vmem [shape: f32[16,32], index: 1, kind: input, shape index: {}]   ;;  %s949_s2 = inlined_call_operand.vmem [shape: f32[64,32], index: 2, kind: input, shape index: {}]   ;;  %s950_s3 = inlined_call_operand.vmem [shape: f32[1,32], index: 3, kind: input, shape index: {}]   ;;  %s951_s4 = inlined_call_operand.vmem [shape: f32[1,32], index: 4, kind: input, shape index: {}]   ;;  %s952_s5 = inlined_call_operand.vmem [shape: f32[1,32], index: 5, kind: input, shape index: {}]   ;;  %s953_s6 = inlined_call_operand.hbm [shape: f32[16,32], index: 6, kind: output, shape index: {}]  }
   0x1   :  { %13 = vsyncpa [#allocation4 + $0x1], 0  ;;  %s794_s21 = smov 0   ;;  %s796_s22 = smov 0  }
   0x2   :  { %s798_s23 = smov 0   ;;  %s800_s24 = smov 0  }
   0x3   :  { %s802_s25 = smov 0   ;;  %s804_s26 = smov 0  }
   0x4 LB: > { %s558_s27 = sadd.s32 4294967295, %s753_s26   ;;  %s559_s28 = sadd.s32 4294967294, %s753_s26   ;;  %s753_s26 = sphi %s804_s26, %s19_s26   ;;  %s749_s25 = sphi %s802_s25, %s960_s25   ;;  %s745_s24 = sphi %s800_s24, %s959_s24   ;;  %s741_s23 = sphi %s798_s23, %s958_s23   ;;  %s737_s22 = sphi %s796_s22, %s957_s22   ;;  %s733_s21 = sphi %s794_s21, %s956_s21  }
   0x5   : > { %s31_s29 = sadd.s32 1, %s749_s25  ;;  %s181_s30 = sadd.s32 1, %s741_s23 }
   0x6   : > { %p33_p0 = scmp.ge.s32.totalorder %s31_s29, 2  ;;  %p191_p1 = scmp.ne.s32.totalorder %s741_s23, %s737_s22 }
   0x7   : > { %p192_p2 = scmp.eq.s32.totalorder %s558_s27, 1  ;;  %p197_p3 = scmp.ne.s32.totalorder %s737_s22, %s733_s21 }
   0x8   : > { %s962_s29 = smov (%p33_p0, %s31_s29), 0  ;;  %p198_p5 = scmp.eq.s32.totalorder %s559_s28, 1 }
   0x9   : > { %p834_p4 = por %p192_p2, %p191_p1  ;;  %s178_s8 = ssub.s32 %s749_s25, %s962_s29 }
   0xa   : > { %p563_p6 = scmp.ge.s32.totalorder %s753_s26, 1  ;;  %p179_p7 = scmp.eq.s32.totalorder %s178_s8, 0 }
   0xb   : > { %p841_p8 = por %p198_p5, %p197_p3  ;;  %p251_p9 = scmp.lt.s32.totalorder %s753_s26, 3 }
   0xc   : > { %s847_s10 = scalar_select %p179_p7, %s741_s23, %s181_s30  }
   0xd   : > { %p252_p10 = pnand %p563_p6, %p251_p9 }
   0xe   : > { %v317_v0 = vld [vmem:[%s949_s2] sm:$0xff] (!%p252_p10)  ;;  %v318_v1 = vld [vmem:[%s949_s2 + $0x8] sm:$0xff] (!%p252_p10)  ;;  %v319_v2 = vld [vmem:[%s949_s2 + $0x10] sm:$0xff] (!%p252_p10)  ;;  %vm313_vm0 = vcmask (!%p252_p10), 261120   ;;  %v755_v3 = vmov (!%p252_p10), 0.0|0.0   ;;  %v756_v6 = vmov (!%p252_p10), 0.0  }
   0xf   : > { %255 = sbr.rel (%p252_p10) target bundleno = 585 (0x249), region = 44  ;;  %603 = vmatprep.subr.bf16.mxu0 (!%p252_p10), %v755_v3  ;;  %v604_v4 = vpack.c.bf16 (!%p252_p10), %v318_v1, %v317_v0  ;;  %v320_v5 = vld [vmem:[%s949_s2 + $0x18] sm:$0xff] (!%p252_p10)  ;;  %314 = vst.msk [vmem:[#allocation2] sm:$0xff] (!%p252_p10), %vm313_vm0, %v756_v6  ;;  %p292_p11 = scmp.lt.s32.totalorder (!%p252_p10), %s745_s24, 1  ;;  %vm757_vm1 = vmmov (!%p252_p10), 0   ;;  %v321_v8 = vld [vmem:[%s949_s2 + $0x20] sm:$0xff] (!%p252_p10) }
  0x10   : > { %600 = vmatprep.mubr.msk.f32.mxu0 (!%p252_p10), %vm757_vm1, %v756_v6  ;;  %v607_v7 = vpack.c.bf16 (!%p252_p10), %v320_v5, %v319_v2  ;;  %v322_v9 = vld [vmem:[%s949_s2 + $0x28] sm:$0xff] (!%p252_p10)  ;;  %v323_v11 = vld [vmem:[%s949_s2 + $0x30] sm:$0xff] (!%p252_p10)  ;;  %v324_v12 = vld [vmem:[%s949_s2 + $0x38] sm:$0xff] (!%p252_p10)  ;;  %vm325_vm2 = vcmask (!%p252_p10), 523264   ;;  %s572_s15 = sshll.u32 (!%p252_p10), %s745_s24, 7 }
  0x11   : > { %605 = vmatpush3.bf16.msra.mxu0 (!%p252_p10), %v604_v4  ;;  %v610_v10 = vpack.c.bf16 (!%p252_p10), %v322_v9, %v321_v8  ;;  %v613_v13 = vpack.c.bf16 (!%p252_p10), %v324_v12, %v323_v11  ;;  %v568_v19 = vld [vmem:[%s950_s3] ss:$0 sm:$0xff] (!%p252_p10) }
  0x12   : > { %606 = vmatprep.subr.bf16.mxu0 (!%p252_p10), %v755_v3  ;;  %v569_v34 = vld [vmem:[%s951_s4] ss:$0 sm:$0xff] (!%p252_p10) }
  0x13   : > { %v570_v36 = vld [vmem:[%s952_s5] ss:$0 sm:$0xff] (!%p252_p10) }
  0x15   : > { %608 = vmatpush3.bf16.msra.mxu0 (!%p252_p10), %v607_v7 }
  0x16   : > { %s293_s30 = scalar_select %p292_p11, %s745_s24, 1  ;;  %609 = vmatprep.subr.bf16.mxu0 %v755_v3  ;;  %v315_v15 = vld [vmem:[#allocation2] sm:$0xff] }
  0x17   : > { %s758_s24 = smov [#allocation3]  }
  0x18   : > { %s565_s14 = sshll.u32 %s293_s30, 3  ;;  %s289_s30 = sand.u32 1, %s737_s22  }
  0x19   : > { %611 = vmatpush3.bf16.msra.mxu0 %v610_v10  ;;  %s298_s17 = scalar_lea.vmem %s947_s0, %s565_s14  ;;  %s302_s20 = scalar_lea.vmem %s948_s1, %s565_s14 }
  0x1a   : > { %612 = vmatprep.subr.bf16.mxu0 %v755_v3  ;;  %v316_v14 = vld [vmem:[%s298_s17] sm:$0xff]  ;;  %s564_s8 = sshll.u32 %s289_s30, 3  ;;  %s448_s27 = scalar_lea.sflag [#allocation4], %s289_s30 }
  0x1b   : > { %v414_v21 = vld [vmem:[%s302_s20] sm:$0xff]  ;;  %s291_s16 = scalar_lea.vmem [#allocation3], %s564_s8  ;;  %s899_s20 = scalar_lea.hbm %s953_s6, %s572_s15 }
  0x1c   : > { %s461_s17 = sshll.u32 %s291_s16, 4  ;;  %s679_s8 = sshll.u32 %s758_s24, 4  ;;  %s901_s17 = int_to_ptr.vmem [resolvable:$true] %s461_s17  ;;  %s680_s8 = int_to_ptr.vmem [resolvable:$false] %s679_s8 }
  0x1d   : > { %614 = vmatpush3.bf16.msra.mxu0 %v613_v13  ;;  %s675_s28 = scalar_lea.vmem %s901_s17, 128  ;;  %s681_s11 = scalar_lea.vmem %s680_s8, 256 }
  0x1e   : > { %p676_p12 = scmp.ne.s32.totalorder %s901_s17, %s675_s28  ;;  %p682_p1 = scmp.lt.s32.totalorder %s901_s17, %s680_s8 }
  0x1f   : > { %p683_p2 = scmp.lt.s32.totalorder %s681_s11, %s675_s28 }
  0x20   : > { %601 = vmatmul.mubr.msk.f32.vlgmr.msra.gmra.mrb[0].mxu0 %vm325_vm2, %v316_v14  ;;  %p677_p13 = pnand %p676_p12, %p834_p4 }
  0x21   : > { %p684_p3 = por %p683_p2, %p682_p1 }
  0x22   : > { %p678_p0 = pneg %p677_p13 }
  0x24   : > { %p685_p5 = pnand %p684_p3, %p678_p0 }
  0xf3   : > { %v395_v16 = vpop.f32.mrb[0].mxu0 }
  0xf4   : > { %v399_v17 = vadd.f32 %v395_v16, %v315_v15  ;;  %v602_v18 = vpop.f32.mrb[1].mxu0 }
  0xf6   : > { %401 = vst.msk [vmem:[#allocation2] sm:$0xff] %vm313_vm0, %v399_v17 }
  0xfd   : > { %v405_v20 = vld [vmem:[#allocation2] sm:$0xff] }
  0xfe   : > { %v413_v22 = vadd.f32 %v568_v19, %v405_v20 }
 0x100   : > { %v415_v23 = vadd.f32 %v414_v21, %v413_v22 }
 0x102   : > { %v416_v24 = vsel %vm313_vm0, %v415_v23, 0.0 }
 0x103   : > { %417 = vadd.xlane.f32.xlu0 %v416_v24 }
 0x190   : > { %v418_v25 = vpop.xlane.xlu0 %417 }
 0x191   : > { %v420_v26 = vmul.f32 0.03125, %v418_v25 }
 0x193   : > { %v421_v27 = vsub.f32 %v415_v23, %v420_v26 }
 0x195   : > { %v422_v28 = vmul.f32 %v421_v27, %v421_v27 }
 0x197   : > { %v423_v29 = vsel %vm313_vm0, %v422_v28, 0.0 }
 0x198   : > { %424 = vadd.xlane.f32.xlu0 %v423_v29 }
 0x225   : > { %v425_v30 = vpop.xlane.xlu0 %424 }
 0x226   : > { %v426_v31 = vmul.f32 0.03125, %v425_v30 }
 0x228   : > { %v427_v32 = vadd.f32 1e-12, %v426_v31 }
 0x22a   : > { %673 = vrsqrt.f32 %v427_v32 }
 0x234   : > { %v674_v33 = vpop.eup %673 }
 0x235   : > { %v429_v35 = vmul.f32 %v674_v33, %v421_v27 }
 0x237   : > { %v437_v37 = vmul.f32 %v569_v34, %v429_v35 }
 0x239   : > { %v445_v38 = vadd.f32 %v570_v36, %v437_v37 }
 0x23b   : > { %446 = vst.msk [vmem:[%s291_s16] sm:$0xff] %vm313_vm0, %v445_v38 }
 0x23c   : > { %688 = shalt.err (!%p685_p5)
}
 0x23d   : > { %s689_s30 = scalar_lea.hbm %s899_s20, 128  ;;  %s693_s14 = scalar_lea.hbm %s953_s6, 256 }
 0x23e   : > { %p690_p6 = scmp.ne.s32.totalorder %s899_s20, %s689_s30  ;;  %p694_p10 = scmp.lt.u32.totalorder %s899_s20, %s953_s6 }
 0x23f   : > { %p695_p11 = scmp.lt.u32.totalorder %s693_s14, %s689_s30  ;;  %p697_p13 = scmp.lt.u32.totalorder %s689_s30, %s899_s20 }
 0x240   : > { %p691_p7 = pnand %p690_p6, %p834_p4 }
 0x241   : > { %p696_p12 = por %p695_p11, %p694_p10 }
 0x242   : > { %p692_p9 = pneg %p691_p7 }
 0x243   : > { %p698_p0 = por %p697_p13, %p696_p12 }
 0x245   : > { %p699_p1 = pnand %p698_p0, %p692_p9 }
 0x247   : > { %702 = shalt.err (!%p699_p1)
}
 0x248   : > { %615 = dma.vmem_to_hbm [thread:$0]  (%p834_p4), %s901_s17, 128, %s899_s20, %s448_s27  }
 0x249 PF: > { %p621_p2 = scmp.ge.s32.totalorder %s753_s26, 2  ;;  %s473_s18 = sand.u32 1, %s733_s21  }
 0x24a   : > { %s474_s19 = scalar_lea.sflag [#allocation4], %s473_s18 }
 0x24b   : > { %p618_p3 = pnand %p621_p2, %p841_p8 }
 0x24d   : > { %728 = dma.done.wait (!%p618_p3), %s474_s19, 128  }
 0x24e   : > { %730 = vsyncadd (!%p618_p3), %s474_s19, 4294967168  ;;  %s19_s26 = sadd.s32 1, %s753_s26   ;;  %s956_s21 = smov %s737_s22 }
 0x24f   : > { %p16_p5 = scmp.ge.s32.totalorder %s19_s26, 4   ;;  %s957_s22 = smov %s741_s23 }
 0x250   : > { %s958_s23 = smov %s847_s10  ;;  %s959_s24 = smov %s749_s25 }
 0x251   : > { %s960_s25 = smov %s962_s29  ;;  %18 = sbr.rel (!%p16_p5) target bundleno = 4 (0x4), region = 93 }
 0x258   :  { %479 = vsyncpa [#allocation4], 1 }
 0x259   :  { %481 = vsyncpa [#allocation4 + $0x1], 1 }

</bundles_post_ra>
